<compile_context>
chip_gen: v5e
topology: v5e:2x2
jax: 0.10.0
libtpu: 0.0.40
codegen_flags: <defaults>
</compile_context>

<pallas_src>
import jax
import jax.numpy as jnp
import numpy as np
from jax import lax
from jax.experimental import pallas as pl
from jax.experimental.pallas import tpu as pltpu


def _conv_matmul_kernel(a_ref, w_ref, b_ref, o_ref):
    # a_ref: (K, TM) patch tile (M in lanes), w_ref: (Cout, K),
    # b_ref: (Cout, 1) f32 bias, o_ref: (Cout, TM)
    acc = jnp.dot(w_ref[...], a_ref[...], preferred_element_type=jnp.float32)
    o_ref[...] = (acc + b_ref[...]).astype(o_ref.dtype)


def coherent_frequency_resampler(x, weight, bias=None, *, tm=4096):
    """Per-frequency Conv2d: kernel (1,2), stride (1,2), padding (0,1).

    x:      (B, C_in, F, T)      NCHW
    weight: (C_out, C_in, 1, 2)  PyTorch OIHW
    bias:   (C_out,) or None
    returns (B, C_out, F, T_out) with T_out = (T + 2 - 2)//2 + 1
    """
    B, Cin, F, T = x.shape
    Cout, Cin_w, KH, KT = weight.shape
    assert Cin_w == Cin and KH == 1 and KT == 2
    stride, pad_left = 2, 1
    T_out = (T + 2 * pad_left - KT) // stride + 1        # == T//2 + 1
    pad_right = stride * T_out - T - pad_left            # 1 if T even, 0 if T odd

    # --- wrapper-side prep: ONE fused XLA copy (pad + tiny-axis transpose) ---
    # im2col with stride == kernel size duplicates no data: patches is ~x-sized.
    xp = jnp.pad(x, ((0, 0), (0, 0), (0, 0), (pad_left, pad_right)))
    xr = xp.reshape(B, Cin, F, T_out, KT)                 # free (contiguous split)
    K = Cin * KT
    L = F * T_out
    # (B, Cin, KT, F, T_out) -> (B, K, L): K in sublanes, L (large) in lanes.
    patches = jnp.transpose(xr, (0, 1, 4, 2, 3)).reshape(B, K, L)

    # weight (Cout, Cin, 1, KT) -> (Cout, K) matching (ci, kt) flattening order.
    w_mat = weight[:, :, 0, :].reshape(Cout, K).astype(x.dtype)
    if bias is None:
        b_mat = jnp.zeros((Cout, 1), jnp.float32)
    else:
        b_mat = bias.reshape(Cout, 1).astype(jnp.float32)  # epilogue add in f32

    # Tile the lane axis; small inputs use the full extent (single dense block),
    # large ones a 128-multiple tile with a masked ragged tail (no explicit pad).
    tm_eff = L if L <= tm else tm
    grid = (B, pl.cdiv(L, tm_eff))

    itemsize = x.dtype.itemsize
    cost = pl.CostEstimate(
        flops=2 * B * L * K * Cout,
        transcendentals=0,
        bytes_accessed=int((B * K * L + B * Cout * L) * itemsize
                           + Cout * K * itemsize + Cout * 4),
    )

    out = pl.pallas_call(
        _conv_matmul_kernel,
        out_shape=jax.ShapeDtypeStruct((B, Cout, L), x.dtype),
        grid_spec=pltpu.PrefetchScalarGridSpec(
            num_scalar_prefetch=0,
            grid=grid,
            in_specs=[
                pl.BlockSpec((None, K, tm_eff), lambda b, i: (b, 0, i)),
                pl.BlockSpec((Cout, K), lambda b, i: (0, 0)),
                pl.BlockSpec((Cout, 1), lambda b, i: (0, 0)),
            ],
            out_specs=pl.BlockSpec((None, Cout, tm_eff), lambda b, i: (b, 0, i)),
        ),
        compiler_params=pltpu.CompilerParams(
            dimension_semantics=("parallel", "parallel")),
        cost_estimate=cost,
    )(patches, w_mat, b_mat)

    # (B, Cout, F*T_out) -> NCHW (B, Cout, F, T_out): free contiguous reshape.
    return out.reshape(B, Cout, F, T_out)


def _reference(x, weight, bias):
    y = lax.conv_general_dilated(
        x, weight,
        window_strides=(1, 2),
        padding=((0, 0), (1, 1)),
        dimension_numbers=("NCHW", "OIHW", "NCHW"))
    return y + bias[None, :, None, None]


if __name__ == "__main__":
    key = jax.random.PRNGKey(0)
    k_x, k_w, k_b, k_x2 = jax.random.split(key, 4)

    B, C_in, C_out, F, T = 2, 4, 8, 16, 16
    x = jax.random.normal(k_x, (B, C_in, F, T), dtype=jnp.float32)

    # deterministic parameter init (fan_in-scaled uniform, like PyTorch conv)
    fan_in = C_in * 1 * 2
    bound = 1.0 / np.sqrt(fan_in)
    weight = jax.random.uniform(k_w, (C_out, C_in, 1, 2),
                                minval=-bound, maxval=bound, dtype=jnp.float32)
    bias = jax.random.uniform(k_b, (C_out,),
                              minval=-bound, maxval=bound, dtype=jnp.float32)

    y = jax.block_until_ready(coherent_frequency_resampler(x, weight, bias))
    y_ref = jax.block_until_ready(_reference(x, weight, bias))
    np.testing.assert_allclose(np.asarray(y), np.asarray(y_ref),
                               rtol=1e-5, atol=1e-5)
    assert y.shape == (B, C_out, F, T // 2 + 1)

    # odd time length + ragged last lane block (masked tail store path)
    F2, T2 = 8, 37
    x2 = jax.random.normal(k_x2, (B, C_in, F2, T2), dtype=jnp.float32)
    y2 = jax.block_until_ready(
        coherent_frequency_resampler(x2, weight, bias, tm=128))
    y2_ref = jax.block_until_ready(_reference(x2, weight, bias))
    np.testing.assert_allclose(np.asarray(y2), np.asarray(y2_ref),
                               rtol=1e-5, atol=1e-5)
    assert y2.shape == (B, C_out, F2, T2 // 2 + 1)

    print("KERNEL_OK")
</pallas_src>

<mosaic_0001>
module attributes {stable_mosaic.version = 11 : i64} {
  func.func @_conv_matmul_kernel(%arg0: i32, %arg1: i32, %arg2: memref<1x8x144xf32, #tpu.memory_space<vmem>>, %arg3: memref<8x8xf32, #tpu.memory_space<vmem>>, %arg4: memref<8x1xf32, #tpu.memory_space<vmem>>, %arg5: memref<1x8x144xf32, #tpu.memory_space<vmem>>) attributes {dimension_semantics = [#tpu.dimension_semantics<parallel>, #tpu.dimension_semantics<parallel>], iteration_bounds = array<i64: 2, 1>, scalar_prefetch = 0 : i64, scratch_operands = 0 : i64, tpu.core_type = #tpu.core_type<tc>, window_params = [{transform_indices = @transform_0, window_bounds = array<i64: 1, 8, 144>}, {pipeline_mode = #tpu.pipeline_mode<synchronous>, transform_indices = @transform_1, window_bounds = array<i64: 8, 8>}, {pipeline_mode = #tpu.pipeline_mode<synchronous>, transform_indices = @transform_2, window_bounds = array<i64: 8, 1>}, {transform_indices = @transform_3, window_bounds = array<i64: 1, 8, 144>}]} {
    %c0 = arith.constant 0 : index
    %c0_0 = arith.constant 0 : index
    %0 = vector.load %arg3[%c0, %c0_0] : memref<8x8xf32, #tpu.memory_space<vmem>>, vector<8x8xf32>
    %c0_1 = arith.constant 0 : index
    %c0_2 = arith.constant 0 : index
    %c0_3 = arith.constant 0 : index
    %1 = vector.load %arg2[%c0_1, %c0_2, %c0_3] : memref<1x8x144xf32, #tpu.memory_space<vmem>>, vector<1x8x144xf32>
    %2 = vector.shape_cast %1 : vector<1x8x144xf32> to vector<8x144xf32>
    %cst = arith.constant dense<0.000000e+00> : vector<8x144xf32>
    %3 = tpu.matmul %0, %2, %cst {dimension_numbers = #tpu.dot_dimension_numbers<[1], [0], [0], [1], [0, 0, 1, 1], [], []>} : vector<8x8xf32>, vector<8x144xf32>, vector<8x144xf32> -> vector<8x144xf32>
    %c0_4 = arith.constant 0 : index
    %c0_5 = arith.constant 0 : index
    %4 = vector.load %arg4[%c0_4, %c0_5] : memref<8x1xf32, #tpu.memory_space<vmem>>, vector<8x1xf32>
    %5 = vector.broadcast %4 : vector<8x1xf32> to vector<8x144xf32>
    %6 = arith.addf %3, %5 : vector<8x144xf32>
    %c0_6 = arith.constant 0 : index
    %c0_7 = arith.constant 0 : index
    %c0_8 = arith.constant 0 : index
    %7 = vector.load %arg5[%c0_6, %c0_7, %c0_8] : memref<1x8x144xf32, #tpu.memory_space<vmem>>, vector<1x8x144xf32>
    %8 = vector.shape_cast %7 : vector<1x8x144xf32> to vector<8x144xf32>
    %9 = vector.shape_cast %6 : vector<8x144xf32> to vector<1x8x144xf32>
    tpu.vector_store %arg5[%c0_6, %c0_7, %c0_8], %9 {strides = array<i32>} : memref<1x8x144xf32, #tpu.memory_space<vmem>>, vector<1x8x144xf32>,
    return
  }
  func.func @transform_0(%arg0: i32, %arg1: i32) -> (i32, i32, i32) {
    %c0_i32 = arith.constant 0 : i32
    %c0_i32_0 = arith.constant 0 : i32
    return %arg0, %c0_i32, %arg1 : i32, i32, i32
  }
  func.func @transform_1(%arg0: i32, %arg1: i32) -> (i32, i32) {
    %c0_i32 = arith.constant 0 : i32
    %c0_i32_0 = arith.constant 0 : i32
    %c0_i32_1 = arith.constant 0 : i32
    return %c0_i32, %c0_i32_0 : i32, i32
  }
  func.func @transform_2(%arg0: i32, %arg1: i32) -> (i32, i32) {
    %c0_i32 = arith.constant 0 : i32
    %c0_i32_0 = arith.constant 0 : i32
    %c0_i32_1 = arith.constant 0 : i32
    return %c0_i32, %c0_i32_0 : i32, i32
  }
  func.func @transform_3(%arg0: i32, %arg1: i32) -> (i32, i32, i32) {
    %c0_i32 = arith.constant 0 : i32
    %c0_i32_0 = arith.constant 0 : i32
    return %arg0, %c0_i32, %arg1 : i32, i32, i32
  }
}

</mosaic_0001>

<bundles_post_ra>
// kernel: tpu_custom_call.1
= control target key start
LH: loop header
LB: loop body
LE: loop exit
PB: predicated region body
PF: predicated region fallthrough
CT: control target
= control target key end

     0   :  { %8 = vsyncpa [#allocation3], 0  ;;  %s712_s0 = inlined_call_operand.hbm [shape: f32[2,8,144], index: 0, kind: input, shape index: {}]   ;;  %s713_s1 = inlined_call_operand.vmem [shape: f32[8,8], index: 1, kind: input, shape index: {}]   ;;  %s714_s2 = inlined_call_operand.vmem [shape: f32[8,1], index: 2, kind: input, shape index: {}]   ;;  %s715_s3 = inlined_call_operand.hbm [shape: f32[2,8,144], index: 3, kind: output, shape index: {}]  }
   0x1   :  { %10 = vsyncpa [#allocation3 + $0x1], 0 }
   0x2   :  { %11 = vsyncpa [#allocation4], 0 }
   0x3   :  { %13 = vsyncpa [#allocation4 + $0x1], 0  ;;  %s586_s12 = smov 0   ;;  %s588_s13 = smov 0  }
   0x4   :  { %s590_s14 = smov 0   ;;  %s592_s15 = smov 0  }
   0x5   :  { %s594_s16 = smov 0   ;;  %s596_s17 = smov 0  }
   0x6 LB: > { %s368_s18 = sadd.s32 4294967295, %s563_s17   ;;  %s369_s19 = sadd.s32 4294967294, %s563_s17   ;;  %s563_s17 = sphi %s596_s17, %s19_s17   ;;  %s559_s16 = sphi %s594_s16, %s724_s16   ;;  %s555_s15 = sphi %s592_s15, %s723_s15   ;;  %s551_s14 = sphi %s590_s14, %s722_s14   ;;  %s547_s13 = sphi %s588_s13, %s721_s13   ;;  %s543_s12 = sphi %s586_s12, %s720_s12  }
   0x7   : > { %s31_s20 = sadd.s32 1, %s559_s16  ;;  %s40_s21 = sadd.s32 1, %s551_s14 }
   0x8   : > { %p33_p0 = scmp.ge.s32.totalorder %s31_s20, 2  ;;  %p47_p1 = scmp.ne.s32.totalorder %s551_s14, %s547_s13 }
   0x9   : > { %p48_p2 = scmp.eq.s32.totalorder %s563_s17, 0  ;;  %p53_p3 = scmp.ne.s32.totalorder %s547_s13, %s543_s12 }
   0xa   : > { %s726_s20 = smov (%p33_p0, %s31_s20), 0  ;;  %p54_p5 = scmp.eq.s32.totalorder %s368_s18, 0 }
   0xb   : > { %p627_p4 = por %p48_p2, %p47_p1  ;;  %s35_s23 = ssub.s32 %s559_s16, %s726_s20 }
   0xc   : > { %p121_p6 = scmp.eq.s32.totalorder %s368_s18, 1  ;;  %p38_p7 = scmp.eq.s32.totalorder %s35_s23, 0 }
   0xd   : > { %p633_p8 = por %p54_p5, %p53_p3  ;;  %p127_p10 = scmp.eq.s32.totalorder %s369_s19, 1 }
   0xe   : > { %p637_p9 = por %p121_p6, %p47_p1  ;;  %p371_p12 = scmp.ge.s32.totalorder %s563_s17, 2 }
   0xf   : > { %s642_s26 = scalar_select %p38_p7, %s551_s14, %s40_s21  }
  0x10   : > { %p644_p11 = por %p127_p10, %p53_p3  ;;  %p399_p13 = scmp.lt.s32.totalorder %s563_s17, 2 }
  0x11   : > { %s153_s28 = sand.u32 1, %s551_s14   ;;  %s385_s30 = sshll.u32 %s559_s16, 4 }
  0x12   : > { %s372_s29 = sshll.u32 %s153_s28, 4  ;;  %s164_s6 = scalar_lea.hbm %s712_s0, %s385_s30 }
  0x13   : > { %s157_s7 = scalar_lea.vmem [#allocation2], %s372_s29  ;;  %s166_s9 = sshll.u32 %s164_s6, 4  ;;  %s167_s9 = int_to_ptr.hbm [resolvable:$true] %s166_s9 }
  0x14   : > { %s168_s8 = sshll.u32 %s157_s7, 4  ;;  %p392_p0 = pnand %p399_p13, %p627_p4  ;;  %s169_s8 = int_to_ptr.vmem [resolvable:$true] %s168_s8 }
  0x15   : > { %p375_p1 = scmp.ge.s32.totalorder %s563_s17, 1  ;;  %p173_p2 = scmp.lt.s32.totalorder %s563_s17, 3 }
  0x16   : > { %s154_s10 = scalar_lea.sflag [#allocation3], %s153_s28 }
  0x17   : > { %394 = dma.hbm_to_vmem [thread:$0]  (!%p392_p0), %s167_s9, 256, %s169_s8, %s154_s10  }
  0x18   : > { %p174_p3 = pnand %p375_p1, %p173_p2 }
  0x19   : > { %s660_s11 = sand.u32 (!%p174_p3), 1, %s547_s13  }
  0x1a   : > { %177 = sbr.rel (%p174_p3) target bundleno = 166 (0xa6), region = 32  ;;  %s376_s18 = sshll.u32 (!%p174_p3), %s660_s11, 4 }
  0x1b   : > { %s180_s19 = scalar_lea.sflag (!%p174_p3), [#allocation3], %s660_s11  ;;  %s183_s21 = scalar_lea.vmem (!%p174_p3), [#allocation2], %s376_s18 }
  0x1f   : > { %534 = dma.done.wait (%p633_p8), %s180_s19, 256  }
  0x20   : > { %536 = vsyncadd (%p633_p8), %s180_s19, 4294967040  ;;  %v565_v0 = vmov 0   ;;  %vm218_vm0 = vcmask 64512   ;;  %v210_v1 = vld [vmem:[%s183_s21] sm:$0xff]  ;;  %v211_v2 = vld [vmem:[%s183_s21 + $0x8] sm:$0xff]  ;;  %s386_s24 = sshll.u32 %s555_s15, 4 }
  0x21   : > { %450 = vset.pattern.permute.xlu0 %v565_v0  ;;  %v209_v3 = vld [vmem:[%s713_s1] sm:$0xff]  ;;  %237 = vmatpush.msra.mxu0 %v210_v1  ;;  %s279_s5 = scalar_lea.hbm %s715_s3, %s386_s24  ;;  %s206_s6 = scalar_lea.vmem [#allocation5], %s376_s18  ;;  %vm263_vm1 = vcmask 130048  }
  0x22   : > { %257 = vmatpush.msra.mxu1 %v211_v2  ;;  %v212_v4 = vld [vmem:[%s714_s2] sm:$0xff]  ;;  %378 = vmatmul.msk.f32.vlgmr.msra.gmra.mxu0 %vm218_vm0, %v209_v3  ;;  %s281_s7 = sshll.u32 %s206_s6, 4  ;;  %s283_s8 = sshll.u32 %s279_s5, 4  ;;  %s282_s7 = int_to_ptr.vmem [resolvable:$true] %s281_s7  ;;  %s284_s8 = int_to_ptr.hbm [resolvable:$true] %s283_s8 }
  0x23   : > { %379 = vmatmul.msk.f32.vlgmr.msra.gmra.mxu1 %vm218_vm0, %v209_v3  ;;  %215 = vperm.xlu0 %450, %v212_v4   ;;  %s266_s9 = scalar_lea.sflag [#allocation4], %s660_s11  ;;  %s495_s15 = sshra.s32 %s284_s8, 4  ;;  %s496_s15 = int_to_ptr.hbm [resolvable:$true] %s495_s15 }
  0x24   : > { %s497_s10 = scalar_lea.hbm %s496_s15, 16  ;;  %s501_s21 = scalar_lea.hbm %s715_s3, 32 }
  0x25   : > { %p498_p4 = scmp.ne.s32.totalorder %s496_s15, %s497_s10  ;;  %p502_p7 = scmp.lt.s32.totalorder %s496_s15, %s715_s3 }
  0x26   : > { %p503_p8 = scmp.lt.s32.totalorder %s501_s21, %s497_s10 }
  0x27   : > { %p499_p5 = pnand %p498_p4, %p637_p9 }
  0x28   : > { %p504_p10 = por %p503_p8, %p502_p7 }
  0x29   : > { %p500_p6 = pneg %p499_p5 }
  0x2b   : > { %p505_p13 = pnand %p504_p10, %p500_p6 }
  0x95   : > { %v216_v5 = vpop.permute.xlu0 %215 }
  0x9f   : > { %v239_v6 = vpop.f32.mrf.mxu0 }
  0xa0   : > { %v259_v7 = vpop.f32.mrf.mxu1  ;;  %v240_v8 = vadd.f32 %v239_v6, %v216_v5 }
  0xa1   : > { %v260_v9 = vadd.f32 %v259_v7, %v216_v5 }
  0xa2   : > { %262 = vst [vmem:[%s206_s6] sm:$0xff] %v240_v8 }
  0xa3   : > { %264 = vst.msk [vmem:[%s206_s6 + $0x8] sm:$0xff] %vm263_vm1, %v260_v9 }
  0xa4   : > { %508 = shalt.err (!%p505_p13)
}
  0xa5   : > { %389 = dma.vmem_to_hbm [thread:$0]  (%p637_p9), %s282_s7, 256, %s284_s8, %s266_s9  }
  0xa6 PF: > { %s295_s11 = sand.u32 1, %s543_s12   ;;  %p396_p0 = pnand %p371_p12, %p644_p11 }
  0xa7   : > { %s296_s28 = scalar_lea.sflag [#allocation4], %s295_s11 }
  0xa8   : > { %p397_p1 = pneg %p396_p0 }
  0xaa   : > { %538 = dma.done.wait (%p397_p1), %s296_s28, 256  }
  0xab   : > { %540 = vsyncadd (%p397_p1), %s296_s28, 4294967040  ;;  %s19_s17 = sadd.s32 1, %s563_s17   ;;  %s720_s12 = smov %s547_s13 }
  0xac   : > { %p16_p2 = scmp.ge.s32.totalorder %s19_s17, 4   ;;  %s721_s13 = smov %s551_s14 }
  0xad   : > { %s722_s14 = smov %s642_s26  ;;  %s723_s15 = smov %s559_s16 }
  0xae   : > { %s724_s16 = smov %s726_s20  ;;  %18 = sbr.rel (!%p16_p2) target bundleno = 6 (0x6), region = 77 }
  0xb3   :  { %302 = vsyncpa [#allocation3], 1 }
  0xb4   :  { %304 = vsyncpa [#allocation3 + $0x1], 1 }
  0xb5   :  { %305 = vsyncpa [#allocation4], 1 }
  0xb6   :  { %307 = vsyncpa [#allocation4 + $0x1], 1 }

</bundles_post_ra>
